<compile_context>
chip_gen: v7x
topology: tpu7x:2x2x1
jax: 0.10.0
libtpu: 0.0.40
codegen_flags: <defaults>
</compile_context>

<pallas_src>
import functools

import jax
import jax.numpy as jnp
from jax.experimental import pallas as pl
from jax.experimental.pallas import tpu as pltpu


# ~2 MiB per block.  With default double buffering, in + out = 4x block bytes
# = ~8 MiB of VMEM, comfortably inside the v5e 16 MiB scoped default (and far
# under v6e/v7x 32 MiB), so no vmem_limit_bytes override is needed.
_TARGET_BLOCK_BYTES = 2 << 20


def _scale_kernel(s_ref, o_ref, *, factor: float):
    # `factor` is a trace-time Python float (weak-typed): the multiply stays in
    # the parameter's native dtype (bf16-native VPUs on v6e/v7x), matching
    # torch's tensor * python-float semantics.
    o_ref[...] = s_ref[...] * factor


def scale_forward(s: jax.Array, init: float, scale: float) -> jax.Array:
    """Compute s * (init / scale) directly on the original (heads, dim) array."""
    factor = float(init) / float(scale)
    heads, dim = s.shape
    dtype = s.dtype
    itemsize = jnp.dtype(dtype).itemsize

    # Lane (last-dim) block: use the full `dim` when modest (a full-extent block
    # bypasses the 128-lane divisibility rule -> no padding, no reshape),
    # otherwise a 128-aligned chunk sized near the target.
    max_w = max(128, (_TARGET_BLOCK_BYTES // (8 * itemsize)) // 128 * 128)
    block_w = dim if dim <= max_w else max_w

    # Sublane (row) block: full `heads` when one block fits the target,
    # otherwise a multiple of 8 so one block is ~_TARGET_BLOCK_BYTES.  Ragged
    # last blocks (pl.cdiv grid) are masked by Pallas — no wrapper-side pad.
    rows_target = max(8, (_TARGET_BLOCK_BYTES // (block_w * itemsize)) // 8 * 8)
    block_h = heads if heads <= rows_target else rows_target

    grid = (pl.cdiv(heads, block_h), pl.cdiv(dim, block_w))

    return pl.pallas_call(
        functools.partial(_scale_kernel, factor=factor),
        out_shape=jax.ShapeDtypeStruct((heads, dim), dtype),
        grid=grid,
        in_specs=[pl.BlockSpec((block_h, block_w), lambda i, j: (i, j))],
        out_specs=pl.BlockSpec((block_h, block_w), lambda i, j: (i, j)),
        compiler_params=pltpu.CompilerParams(
            dimension_semantics=("parallel", "parallel")),
    )(s)


class ScalePallas:
    """JAX/Pallas counterpart of the PyTorch `Scale` module."""

    def __init__(self, dim: int, heads: int = 1, scale: float = 1.0,
                 init: float = 1.0, dtype=jnp.float32):
        self.init = init
        self.scale = scale
        # Deterministic parameter init, exactly like torch.ones(heads, dim) * scale
        self.s = jnp.ones((heads, dim), dtype=dtype) * scale

    def __call__(self) -> jax.Array:
        return scale_forward(self.s, self.init, self.scale)


if __name__ == "__main__":
    key = jax.random.PRNGKey(0)
    k1, k2, k3 = jax.random.split(key, 3)

    scale_val, init_val = 0.5, 1.0
    factor = init_val / scale_val

    # Case 1: small nGPT-style parameter (heads=2, dim=32) -> single full-array block.
    heads, dim = 2, 32
    mod = ScalePallas(dim=dim, heads=heads, scale=scale_val, init=init_val)
    # Perturb deterministically so the test is not trivially all-equal values.
    mod.s = mod.s + 0.01 * jax.random.normal(k1, (heads, dim), dtype=jnp.float32)
    out = jax.block_until_ready(mod())
    ref = mod.s * factor
    assert out.shape == (heads, dim)
    assert jnp.allclose(out, ref, atol=1e-6, rtol=1e-6), "mismatch vs reference (small)"

    # Case 2: bf16 parameter -> multiply stays in bf16 (native-dtype arithmetic).
    heads_b, dim_b = 3, 40
    s_b = (jnp.ones((heads_b, dim_b), jnp.bfloat16) * scale_val
           + (0.01 * jax.random.normal(k2, (heads_b, dim_b))).astype(jnp.bfloat16))
    out_b = jax.block_until_ready(scale_forward(s_b, init_val, scale_val))
    ref_b = s_b * factor
    assert out_b.dtype == jnp.bfloat16
    assert jnp.allclose(out_b.astype(jnp.float32), ref_b.astype(jnp.float32),
                        atol=1e-2, rtol=1e-2), "mismatch vs reference (bf16)"

    # Case 3: larger parameter exercising the tiled, ragged multi-block path
    # (600 rows -> block_h=504 -> grid=(2,1), second block masked at 96 rows).
    heads2, dim2 = 600, 1032
    s2 = (jnp.ones((heads2, dim2), jnp.float32) * scale_val
          + 0.01 * jax.random.normal(k3, (heads2, dim2), dtype=jnp.float32))
    out2 = jax.block_until_ready(scale_forward(s2, init_val, scale_val))
    ref2 = s2 * factor
    assert out2.shape == (heads2, dim2)
    assert jnp.allclose(out2, ref2, atol=1e-6, rtol=1e-6), "mismatch vs reference (tiled)"

    print("KERNEL_OK")
</pallas_src>

<mosaic_0001>
module attributes {stable_mosaic.version = 11 : i64} {
  func.func @_scale_kernel(%arg0: i32, %arg1: i32, %arg2: memref<2x32xf32, #tpu.memory_space<vmem>>, %arg3: memref<2x32xf32, #tpu.memory_space<vmem>>) attributes {dimension_semantics = [#tpu.dimension_semantics<parallel>, #tpu.dimension_semantics<parallel>], iteration_bounds = array<i64: 1, 1>, scalar_prefetch = 0 : i64, scratch_operands = 0 : i64, tpu.core_type = #tpu.core_type<tc>, window_params = [{transform_indices = @transform_0, window_bounds = array<i64: 2, 32>}, {transform_indices = @transform_1, window_bounds = array<i64: 2, 32>}]} {
    %c0 = arith.constant 0 : index
    %c0_0 = arith.constant 0 : index
    %0 = vector.load %arg2[%c0, %c0_0] : memref<2x32xf32, #tpu.memory_space<vmem>>, vector<2x32xf32>
    %cst = arith.constant 2.000000e+00 : f32
    %1 = vector.broadcast %cst : f32 to vector<2x32xf32>
    %2 = arith.mulf %0, %1 : vector<2x32xf32>
    %c0_1 = arith.constant 0 : index
    %c0_2 = arith.constant 0 : index
    %3 = vector.load %arg3[%c0_1, %c0_2] : memref<2x32xf32, #tpu.memory_space<vmem>>, vector<2x32xf32>
    tpu.vector_store %arg3[%c0_1, %c0_2], %2 {strides = array<i32>} : memref<2x32xf32, #tpu.memory_space<vmem>>, vector<2x32xf32>,
    return
  }
  func.func @transform_0(%arg0: i32, %arg1: i32) -> (i32, i32) {
    %c0_i32 = arith.constant 0 : i32
    return %arg0, %arg1 : i32, i32
  }
  func.func @transform_1(%arg0: i32, %arg1: i32) -> (i32, i32) {
    %c0_i32 = arith.constant 0 : i32
    return %arg0, %arg1 : i32, i32
  }
}

</mosaic_0001>

<bundles_post_ra>
// kernel: tpu_custom_call.1
= control target key start
LH: loop header
LB: loop body
LE: loop exit
PB: predicated region body
PF: predicated region fallthrough
CT: control target
= control target key end

     0   :  { %6 = vsyncpa [#allocation3], 0  ;;  %s126_s0 = inlined_call_operand.hbm [shape: f32[2,32], index: 0, kind: input, shape index: {}]   ;;  %s127_s1 = inlined_call_operand.hbm [shape: f32[2,32], index: 1, kind: output, shape index: {}]  }
   0x1   :  { %7 = vsyncpa [#allocation4], 0  ;;  %s90_s6 = smov [#allocation2]   ;;  %s42_s10 = scalar_lea.hbm %s126_s0, 32 }
   0x2   :  { %s14_s7 = sshll.u32 %s90_s6, 4  ;;  %p43_p0 = scmp.ne.s32.totalorder %s126_s0, %s42_s10  ;;  %s15_s7 = int_to_ptr.vmem [resolvable:$true] %s14_s7 }
   0x3   :  { %p46_p1 = scmp.lt.u32.totalorder %s42_s10, %s126_s0 }
   0x5   :  { %p48_p2 = pnand %p46_p1, %p43_p0 }
   0x7   :  { %51 = shalt.err (!%p48_p2)
}
   0x8   :  { %s52_s15 = scalar_lea.vmem %s15_s7, 32  ;;  %p57_p4 = scmp.lt.s32.totalorder %s15_s7, %s15_s7 }
   0x9   :  { %p53_p3 = scmp.ne.s32.totalorder %s15_s7, %s52_s15  ;;  %p58_p5 = scmp.lt.s32.totalorder %s52_s15, %s52_s15 }
   0xb   :  { %p59_p6 = por %p58_p5, %p57_p4 }
   0xd   :  { %p60_p7 = pnand %p59_p6, %p53_p3 }
   0xf   :  { %63 = shalt.err (!%p60_p7)
}
  0x10   :  { %17 = dma.hbm_to_vmem [thread:$0]  %s126_s0, 32, %s15_s7, [#allocation3]  }
  0x11   :  { %86 = dma.done.wait [#allocation3], 32  }
  0x12   :  { %87 = vsyncadd [#allocation3], 4294967264  ;;  %s91_s18 = smov [#allocation5]   ;;  %v21_v0 = vld [vmem:[#allocation2] sm:$0x3]  ;;  %vm23_vm0 = vcmask 254976  }
  0x13   :  { %s31_s19 = sshll.u32 %s91_s18, 4  ;;  %v22_v1 = vmul.f32 2.0, %v21_v0  ;;  %s32_s19 = int_to_ptr.vmem [resolvable:$true] %s31_s19 }
  0x14   :  { %s64_s20 = scalar_lea.vmem %s32_s19, 32  ;;  %p69_p9 = scmp.lt.s32.totalorder %s32_s19, %s32_s19 }
  0x15   :  { %24 = vst.msk [vmem:[#allocation5] sm:$0x3] %vm23_vm0, %v22_v1  ;;  %p65_p8 = scmp.ne.s32.totalorder %s32_s19, %s64_s20  ;;  %p70_p10 = scmp.lt.s32.totalorder %s64_s20, %s64_s20 }
  0x17   :  { %p71_p11 = por %p70_p10, %p69_p9 }
  0x19   :  { %p72_p12 = pnand %p71_p11, %p65_p8 }
  0x1b   :  { %75 = shalt.err (!%p72_p12)
}
  0x1c   :  { %s76_s0 = scalar_lea.hbm %s127_s1, 32 }
  0x1d   :  { %p77_p13 = scmp.ne.s32.totalorder %s127_s1, %s76_s0  ;;  %p80_p0 = scmp.lt.u32.totalorder %s76_s0, %s127_s1 }
  0x1f   :  { %p82_p1 = pnand %p80_p0, %p77_p13 }
  0x21   :  { %85 = shalt.err (!%p82_p1)
}
  0x22   :  { %34 = dma.vmem_to_hbm [thread:$0]  %s32_s19, 32, %s127_s1, [#allocation4]  }
  0x23   :  { %88 = dma.done.wait [#allocation4], 32  }
  0x24   :  { %89 = vsyncadd [#allocation4], 4294967264 }
  0x25   :  { %38 = vsyncpa [#allocation3], 1 }
  0x26   :  { %39 = vsyncpa [#allocation4], 1 }

</bundles_post_ra>
